<compile_context>
chip_gen: v7x
topology: tpu7x:2x2x1
jax: 0.10.0
libtpu: 0.0.40
codegen_flags: <defaults>
</compile_context>

<pallas_src>
import functools
import math

import jax
import jax.numpy as jnp
from jax import lax
from jax.experimental import pallas as pl
from jax.experimental.pallas import tpu as pltpu


# ----------------------------------------------------------------------------
# Generation-aware VMEM budget (review: 48 MiB was a v7x-shaped ceiling
# applied to v5e/v6e as well).
# ----------------------------------------------------------------------------
@functools.lru_cache(maxsize=None)
def _vmem_limit_bytes():
    cap = None
    try:
        cap = getattr(pltpu.get_tpu_info(), "vmem_capacity_bytes", None)
    except Exception:
        cap = None
    if not cap:
        return 48 * 1024 * 1024          # conservative fallback, safe on v7x
    # ~75% of physical, capped: ~48 MiB on v7x (64 MiB/TC), ~96 MiB on v5e/v6e.
    return min((int(cap) * 3) // 4, 100 * 1024 * 1024)


def _pick_tile(dim, candidates, *, min_steps=1):
    """Largest candidate that evenly divides `dim`, preferring choices that give
    at least `min_steps` grid steps (v7x megacore); else the full dim."""
    divisors = [t for t in candidates if t <= dim and dim % t == 0]
    for t in divisors:
        if dim // t >= min_steps:
            return t
    if divisors:
        return divisors[0]
    # TODO(synk): non-divisible dims fall back to a whole-axis block; very large
    # non-divisible dims would need cdiv grids with remainder masking instead.
    return dim


# ----------------------------------------------------------------------------
# Tiled linear (matmul [+ bias]) kernel — reduction-last grid, f32 accumulator.
# Operands arrive already in their MXU dtype (casting is done by the wrapper).
# ----------------------------------------------------------------------------
def _linear_kernel(*refs, add_bias):
    if add_bias:
        x_ref, w_ref, b_ref, o_ref, acc_ref = refs
    else:
        x_ref, w_ref, o_ref, acc_ref = refs

    k = pl.program_id(2)

    @pl.when(k == 0)
    def _init():
        acc_ref[...] = jnp.zeros_like(acc_ref)

    acc_ref[...] += jnp.dot(x_ref[...], w_ref[...],
                            preferred_element_type=jnp.float32)

    @pl.when(k == pl.num_programs(2) - 1)
    def _finalize():
        out = acc_ref[...]
        if add_bias:
            out = out + b_ref[...].astype(jnp.float32)
        o_ref[...] = out.astype(o_ref.dtype)


def pallas_linear(x, w, b=None, *, out_dtype=None):
    """x: (M, d_in), w: (d_in, d_out), b: (d_out,) or None -> (M, d_out)."""
    M, d_in = x.shape
    d_out = w.shape[1]
    out_dtype = x.dtype if out_dtype is None else out_dtype

    # Larger output tiles amortise the ~0.35 us per-grid-step overhead; tm
    # prefers >= 2 steps so both v7x TensorCores get work on the parallel axis.
    tm = _pick_tile(M, (512, 256, 128), min_steps=2)
    tn = _pick_tile(d_out, (1024, 512, 256, 128))
    tk = _pick_tile(d_in, (512, 256, 128))

    add_bias = b is not None
    in_specs = [
        pl.BlockSpec((tm, tk), lambda i, j, k: (i, k)),
        pl.BlockSpec((tk, tn), lambda i, j, k: (k, j)),
    ]
    args = [x, w]
    if add_bias:
        in_specs.append(pl.BlockSpec((1, tn), lambda i, j, k: (0, j)))
        args.append(b.reshape(1, d_out))

    kernel = functools.partial(_linear_kernel, add_bias=add_bias)
    return pl.pallas_call(
        kernel,
        out_shape=jax.ShapeDtypeStruct((M, d_out), out_dtype),
        grid_spec=pltpu.PrefetchScalarGridSpec(
            num_scalar_prefetch=0,
            grid=(M // tm, d_out // tn, d_in // tk),
            in_specs=in_specs,
            out_specs=pl.BlockSpec((tm, tn), lambda i, j, k: (i, j)),
            scratch_shapes=[pltpu.VMEM((tm, tn), jnp.float32)],
        ),
        compiler_params=pltpu.CompilerParams(
            dimension_semantics=("parallel", "parallel", "arbitrary"),
            vmem_limit_bytes=_vmem_limit_bytes(),
        ),
    )(*args)


# ----------------------------------------------------------------------------
# Attention kernel: grid (B, Sq-tiles, Sk-tiles), online softmax over Sk tiles,
# all heads processed in-kernel with per-head f32 accumulator scratch.
# ----------------------------------------------------------------------------
def _mha_kernel(q_ref, k_ref, v_ref, *rest, num_heads, d_k, scale,
                return_attention):
    if return_attention:
        h_ref, a_ref, m_ref, l_ref, acc_ref = rest
    else:
        h_ref, m_ref, l_ref, acc_ref = rest

    ki = pl.program_id(2)

    @pl.when(ki == 0)
    def _init():
        m_ref[...] = jnp.full_like(m_ref, -jnp.inf)
        l_ref[...] = jnp.zeros_like(l_ref)
        acc_ref[...] = jnp.zeros_like(acc_ref)

    q = q_ref[0]            # (blk_q, d_model)  — operands already in MXU dtype
    k = k_ref[0]            # (blk_k, d_model)
    v = v_ref[0]            # (blk_k, d_model)

    # TODO(synk): the optional additive `mask` of the reference module is not
    # wired through (this forward corresponds to mask=None).
    # TODO(synk): per-head lane slices are only 128-aligned when d_k % 128 == 0;
    # for small d_k a head-major layout / head-batched dot would fill the
    # 256-wide MXU better, at the cost of an HBM relayout of Q/K/V.
    for h in range(num_heads):
        lo, hi = h * d_k, (h + 1) * d_k
        q_h = q[:, lo:hi]
        k_h = k[:, lo:hi]
        v_h = v[:, lo:hi]

        # scores in f32; 1/sqrt(d_k) applied once to the f32 scores (no per-head
        # q upcast / downcast round-trip).
        s = lax.dot_general(q_h, k_h, (((1,), (1,)), ((), ())),
                            preferred_element_type=jnp.float32) * scale

        m_prev = m_ref[h]                                        # (blk_q, 1)
        m_new = jnp.maximum(m_prev, jnp.max(s, axis=-1, keepdims=True))
        alpha = jnp.exp(m_prev - m_new)
        p = jnp.exp(s - m_new)                                   # f32
        l_new = alpha * l_ref[h] + jnp.sum(p, axis=-1, keepdims=True)
        m_ref[h] = m_new
        l_ref[h] = l_new

        pv = lax.dot_general(p.astype(v_h.dtype), v_h, (((1,), (0,)), ((), ())),
                             preferred_element_type=jnp.float32)
        acc_ref[h] = alpha * acc_ref[h] + pv                     # per-head acc

        if return_attention:
            # Single kv step enforced by the wrapper => l_new is the full
            # row-sum; exact reciprocal for the externally visible A.
            a_ref[0, h] = (p * pl.reciprocal(l_new)).astype(a_ref.dtype)

    @pl.when(ki == pl.num_programs(2) - 1)
    def _finalize():
        for h in range(num_heads):
            lo, hi = h * d_k, (h + 1) * d_k
            inv_l = pl.reciprocal(l_ref[h], approx=True)         # EUP slot
            h_ref[0, :, lo:hi] = (acc_ref[h] * inv_l).astype(h_ref.dtype)


def pallas_attention(Q, K, V, num_heads, d_k, *, return_attention=True,
                     attn_dtype=jnp.float32, out_dtype=None):
    """Q: (B, Sq, d_model), K/V: (B, Sk, d_model) -> H (B, Sq, d_model) [, A]."""
    B, Sq, d_model = Q.shape
    Sk = K.shape[1]
    out_dtype = Q.dtype if out_dtype is None else out_dtype
    scale = 1.0 / math.sqrt(d_k)

    # blk_q capped at 256 (scores are blk_q*blk_k f32 per head); prefer >= 2
    # total parallel steps so both v7x TensorCores get work even when B == 1.
    blk_q = _pick_tile(Sq, (256, 128), min_steps=(2 if B == 1 else 1))
    if return_attention:
        blk_k = Sk               # A needs full score rows -> single kv step
    else:
        # Flash-style online softmax over Sk tiles: VMEM is O(blk_q * blk_k),
        # independent of sequence length (v7x 64 MiB safe).
        blk_k = _pick_tile(Sk, (512, 256, 128), min_steps=2)

    grid = (B, Sq // blk_q, Sk // blk_k)

    in_specs = [
        pl.BlockSpec((1, blk_q, d_model), lambda b, qi, ki: (b, qi, 0)),
        pl.BlockSpec((1, blk_k, d_model), lambda b, qi, ki: (b, ki, 0)),
        pl.BlockSpec((1, blk_k, d_model), lambda b, qi, ki: (b, ki, 0)),
    ]
    h_shape = jax.ShapeDtypeStruct((B, Sq, d_model), out_dtype)
    h_spec = pl.BlockSpec((1, blk_q, d_model), lambda b, qi, ki: (b, qi, 0))

    if return_attention:
        out_shape = (h_shape,
                     jax.ShapeDtypeStruct((B, num_heads, Sq, Sk), attn_dtype))
        out_specs = (h_spec,
                     pl.BlockSpec((1, num_heads, blk_q, Sk),
                                  lambda b, qi, ki: (b, 0, qi, 0)))
    else:
        out_shape = h_shape
        out_specs = h_spec

    scratch_shapes = [
        pltpu.VMEM((num_heads, blk_q, 1), jnp.float32),      # running max
        pltpu.VMEM((num_heads, blk_q, 1), jnp.float32),      # running sum
        pltpu.VMEM((num_heads, blk_q, d_k), jnp.float32),    # output accum
    ]

    kernel = functools.partial(_mha_kernel, num_heads=num_heads, d_k=d_k,
                               scale=scale, return_attention=return_attention)
    out = pl.pallas_call(
        kernel,
        out_shape=out_shape,
        grid=grid,
        in_specs=in_specs,
        out_specs=out_specs,
        scratch_shapes=scratch_shapes,
        compiler_params=pltpu.CompilerParams(
            dimension_semantics=("parallel", "parallel", "arbitrary"),
            vmem_limit_bytes=_vmem_limit_bytes(),
        ),
    )(Q, K, V)

    if return_attention:
        return out[0], out[1]
    return out, None


# ----------------------------------------------------------------------------
# One-time parameter preparation (hoisted out of the forward pass, per review):
# transpose nn.Linear weights to (in, out), fuse QKV, optional MXU-dtype cast.
# ----------------------------------------------------------------------------
def prepare_params(params, *, mxu_dtype=None):
    wd = params["W_q"].dtype if mxu_dtype is None else mxu_dtype
    Wq_t = params["W_q"].T.astype(wd)
    Wk_t = params["W_k"].T.astype(wd)
    Wv_t = params["W_v"].T.astype(wd)
    prepared = {
        "W_q_t": Wq_t, "W_k_t": Wk_t, "W_v_t": Wv_t,
        "W_h_t": params["W_h"].T.astype(wd),
        "b_h": params["b_h"].astype(jnp.float32),
    }
    if Wq_t.shape[0] == Wk_t.shape[0] == Wv_t.shape[0]:
        prepared["W_qkv"] = jnp.concatenate([Wq_t, Wk_t, Wv_t], axis=1)
    return prepared


# ----------------------------------------------------------------------------
# MultiHeadAttention forward (matches the PyTorch module semantics, mask=None)
# ----------------------------------------------------------------------------
def multi_head_attention(X_q, X_k, X_v, prepared, num_heads, *,
                         mxu_dtype=None, return_attention=True,
                         attn_dtype=jnp.float32):
    B, Sq, d_xq = X_q.shape
    Sk = X_k.shape[1]
    d_model = prepared["W_h_t"].shape[0]
    d_k = d_model // num_heads

    # bf16 casting happens here (once), so kernels DMA half-width operands.
    act_dtype = X_q.dtype if mxu_dtype is None else mxu_dtype

    if (X_q is X_k) and (X_q is X_v) and ("W_qkv" in prepared):
        # Self-attention fast path: one fused QKV matmul, X read once.
        x2 = X_q.reshape(B * Sq, d_xq).astype(act_dtype)
        qkv = pallas_linear(x2, prepared["W_qkv"], out_dtype=act_dtype)
        Q = qkv[:, 0 * d_model:1 * d_model].reshape(B, Sq, d_model)
        K = qkv[:, 1 * d_model:2 * d_model].reshape(B, Sq, d_model)
        V = qkv[:, 2 * d_model:3 * d_model].reshape(B, Sq, d_model)
    else:
        Q = pallas_linear(X_q.reshape(B * Sq, -1).astype(act_dtype),
                          prepared["W_q_t"], out_dtype=act_dtype
                          ).reshape(B, Sq, d_model)
        K = pallas_linear(X_k.reshape(B * Sk, -1).astype(act_dtype),
                          prepared["W_k_t"], out_dtype=act_dtype
                          ).reshape(B, Sk, d_model)
        V = pallas_linear(X_v.reshape(B * Sk, -1).astype(act_dtype),
                          prepared["W_v_t"], out_dtype=act_dtype
                          ).reshape(B, Sk, d_model)

    # Attention consumes the native (B, S, d_model) layout (head split in-kernel)
    # and emits a lane-dense (B, Sq, d_model) H (head merge in-kernel), so the
    # output projection reads it via a free reshape — no HBM relayout.
    H_cat, A = pallas_attention(Q, K, V, num_heads, d_k,
                                return_attention=return_attention,
                                attn_dtype=attn_dtype, out_dtype=act_dtype)

    H = pallas_linear(H_cat.reshape(B * Sq, d_model), prepared["W_h_t"],
                      prepared["b_h"], out_dtype=X_q.dtype
                      ).reshape(B, Sq, d_model)
    return H, A


# ----------------------------------------------------------------------------
# Reference (plain JAX) for sanity checking
# ----------------------------------------------------------------------------
def reference_mha(X_q, X_k, X_v, params, num_heads):
    B, Sq, _ = X_q.shape
    Sk = X_k.shape[1]
    d_model = params["W_q"].shape[0]
    d_k = d_model // num_heads
    Q = (X_q @ params["W_q"].T).reshape(B, Sq, num_heads, d_k).transpose(0, 2, 1, 3)
    K = (X_k @ params["W_k"].T).reshape(B, Sk, num_heads, d_k).transpose(0, 2, 1, 3)
    V = (X_v @ params["W_v"].T).reshape(B, Sk, num_heads, d_k).transpose(0, 2, 1, 3)
    scores = jnp.einsum("bhqd,bhkd->bhqk", Q / math.sqrt(d_k), K)
    A = jax.nn.softmax(scores, axis=-1)
    Hh = jnp.einsum("bhqk,bhkd->bhqd", A, V)
    H_cat = Hh.transpose(0, 2, 1, 3).reshape(B, Sq, d_model)
    H = H_cat @ params["W_h"].T + params["b_h"]
    return H, A


# ----------------------------------------------------------------------------
if __name__ == "__main__":
    # Module config: d_model=32, num_heads=4, d_input=None (=> d_xq=d_xk=d_xv=32)
    d_model = 32
    num_heads = 4
    batch = 2
    seq = 8

    key = jax.random.PRNGKey(0)
    k_wq, k_wk, k_wv, k_wh, k_bh, k_x, k_xk, k_xv, k_big = jax.random.split(key, 9)

    scale = 1.0 / math.sqrt(d_model)
    params = {
        "W_q": jax.random.uniform(k_wq, (d_model, d_model), jnp.float32, -scale, scale),
        "W_k": jax.random.uniform(k_wk, (d_model, d_model), jnp.float32, -scale, scale),
        "W_v": jax.random.uniform(k_wv, (d_model, d_model), jnp.float32, -scale, scale),
        "W_h": jax.random.uniform(k_wh, (d_model, d_model), jnp.float32, -scale, scale),
        "b_h": jax.random.uniform(k_bh, (d_model,), jnp.float32, -scale, scale),
    }
    prepared = prepare_params(params)                        # one-time packing
    prepared_bf16 = prepare_params(params, mxu_dtype=jnp.bfloat16)

    # ---- self-attention (fused QKV path), f32, with A returned ----
    X = jax.random.normal(k_x, (batch, seq, d_model), jnp.float32)
    H, A = multi_head_attention(X, X, X, prepared, num_heads)
    H = jax.block_until_ready(H)
    A = jax.block_until_ready(A)
    H_ref, A_ref = reference_mha(X, X, X, params, num_heads)
    assert H.shape == (batch, seq, d_model)
    assert A.shape == (batch, num_heads, seq, seq)
    assert jnp.max(jnp.abs(H - H_ref)) < 5e-3
    assert jnp.max(jnp.abs(A - A_ref)) < 5e-3

    # ---- cross-attention (separate Q/K/V projections), f32 ----
    X_k = jax.random.normal(k_xk, (batch, seq, d_model), jnp.float32)
    X_v = jax.random.normal(k_xv, (batch, seq, d_model), jnp.float32)
    H2, A2 = multi_head_attention(X, X_k, X_v, prepared, num_heads)
    H2 = jax.block_until_ready(H2)
    H2_ref, A2_ref = reference_mha(X, X_k, X_v, params, num_heads)
    assert jnp.max(jnp.abs(H2 - H2_ref)) < 5e-3
    assert jnp.max(jnp.abs(A2 - A2_ref)) < 5e-3

    # ---- bf16 MXU operands (wrapper-side cast, f32 accumulation) ----
    H3, A3 = multi_head_attention(X, X, X, prepared_bf16, num_heads,
                                  mxu_dtype=jnp.bfloat16)
    H3 = jax.block_until_ready(H3)
    assert jnp.max(jnp.abs(H3 - H_ref)) < 5e-2
    assert jnp.max(jnp.abs(A3 - A_ref)) < 5e-2

    # ---- flash path: longer sequence, A dropped, Sk tiled (multi kv step) ----
    seq_big = 256
    X_big = jax.random.normal(k_big, (batch, seq_big, d_model), jnp.float32)
    H4, A4 = multi_head_attention(X_big, X_big, X_big, prepared, num_heads,
                                  return_attention=False)
    H4 = jax.block_until_ready(H4)
    assert A4 is None
    H4_ref, _ = reference_mha(X_big, X_big, X_big, params, num_heads)
    assert jnp.max(jnp.abs(H4 - H4_ref)) < 5e-3

    print("KERNEL_OK")
</pallas_src>

<mosaic_0001>
module attributes {stable_mosaic.version = 11 : i64} {
  func.func @_linear_kernel(%arg0: i32, %arg1: i32, %arg2: i32, %arg3: memref<16x32xf32, #tpu.memory_space<vmem>>, %arg4: memref<32x96xf32, #tpu.memory_space<vmem>>, %arg5: memref<16x96xf32, #tpu.memory_space<vmem>>, %arg6: memref<16x96xf32, #tpu.memory_space<vmem>>) attributes {dimension_semantics = [#tpu.dimension_semantics<parallel>, #tpu.dimension_semantics<parallel>, #tpu.dimension_semantics<arbitrary>], iteration_bounds = array<i64: 1, 1, 1>, scalar_prefetch = 0 : i64, scratch_operands = 1 : i64, tpu.core_type = #tpu.core_type<tc>, window_params = [{transform_indices = @transform_0, window_bounds = array<i64: 16, 32>}, {transform_indices = @transform_1, window_bounds = array<i64: 32, 96>}, {transform_indices = @transform_2, window_bounds = array<i64: 16, 96>}]} {
    %c0_i32 = arith.constant 0 : i32
    %0 = arith.cmpi eq, %arg2, %c0_i32 : i32
    %1 = arith.extui %0 : i1 to i32
    %c0_i32_0 = arith.constant 0 : i32
    %2 = arith.cmpi ne, %1, %c0_i32_0 : i32
    scf.if %2 {
      %cst_10 = arith.constant 0.000000e+00 : f32
      %12 = vector.broadcast %cst_10 : f32 to vector<16x96xf32>
      %c0_11 = arith.constant 0 : index
      %c0_12 = arith.constant 0 : index
      %13 = vector.load %arg6[%c0_11, %c0_12] : memref<16x96xf32, #tpu.memory_space<vmem>>, vector<16x96xf32>
      tpu.vector_store %arg6[%c0_11, %c0_12], %12 {strides = array<i32>} : memref<16x96xf32, #tpu.memory_space<vmem>>, vector<16x96xf32>,
    } else {
    }
    %c0 = arith.constant 0 : index
    %c0_1 = arith.constant 0 : index
    %3 = vector.load %arg6[%c0, %c0_1] : memref<16x96xf32, #tpu.memory_space<vmem>>, vector<16x96xf32>
    %c0_2 = arith.constant 0 : index
    %c0_3 = arith.constant 0 : index
    %4 = vector.load %arg3[%c0_2, %c0_3] : memref<16x32xf32, #tpu.memory_space<vmem>>, vector<16x32xf32>
    %c0_4 = arith.constant 0 : index
    %c0_5 = arith.constant 0 : index
    %5 = vector.load %arg4[%c0_4, %c0_5] : memref<32x96xf32, #tpu.memory_space<vmem>>, vector<32x96xf32>
    %cst = arith.constant dense<0.000000e+00> : vector<16x96xf32>
    %6 = tpu.matmul %4, %5, %cst {dimension_numbers = #tpu.dot_dimension_numbers<[1], [0], [0], [1], [0, 0, 1, 1], [], []>} : vector<16x32xf32>, vector<32x96xf32>, vector<16x96xf32> -> vector<16x96xf32>
    %7 = arith.addf %3, %6 : vector<16x96xf32>
    %c0_6 = arith.constant 0 : index
    %c0_7 = arith.constant 0 : index
    %8 = vector.load %arg6[%c0_6, %c0_7] : memref<16x96xf32, #tpu.memory_space<vmem>>, vector<16x96xf32>
    tpu.vector_store %arg6[%c0_6, %c0_7], %7 {strides = array<i32>} : memref<16x96xf32, #tpu.memory_space<vmem>>, vector<16x96xf32>,
    %c0_i32_8 = arith.constant 0 : i32
    %9 = arith.cmpi eq, %arg2, %c0_i32_8 : i32
    %10 = arith.extui %9 : i1 to i32
    %c0_i32_9 = arith.constant 0 : i32
    %11 = arith.cmpi ne, %10, %c0_i32_9 : i32
    scf.if %11 {
      %c0_10 = arith.constant 0 : index
      %c0_11 = arith.constant 0 : index
      %12 = vector.load %arg6[%c0_10, %c0_11] : memref<16x96xf32, #tpu.memory_space<vmem>>, vector<16x96xf32>
      %c0_12 = arith.constant 0 : index
      %c0_13 = arith.constant 0 : index
      %13 = vector.load %arg5[%c0_12, %c0_13] : memref<16x96xf32, #tpu.memory_space<vmem>>, vector<16x96xf32>
      tpu.vector_store %arg5[%c0_12, %c0_13], %12 {strides = array<i32>} : memref<16x96xf32, #tpu.memory_space<vmem>>, vector<16x96xf32>,
    } else {
    }
    return
  }
  func.func @transform_0(%arg0: i32, %arg1: i32, %arg2: i32) -> (i32, i32) {
    %c0_i32 = arith.constant 0 : i32
    return %arg0, %arg2 : i32, i32
  }
  func.func @transform_1(%arg0: i32, %arg1: i32, %arg2: i32) -> (i32, i32) {
    %c0_i32 = arith.constant 0 : i32
    return %arg2, %arg1 : i32, i32
  }
  func.func @transform_2(%arg0: i32, %arg1: i32, %arg2: i32) -> (i32, i32) {
    %c0_i32 = arith.constant 0 : i32
    return %arg0, %arg1 : i32, i32
  }
}

</mosaic_0001>

<bundles_post_ra>
// kernel: tpu_custom_call.1
= control target key start
LH: loop header
LB: loop body
LE: loop exit
PB: predicated region body
PF: predicated region fallthrough
CT: control target
= control target key end

     0   :  { %7 = vsyncpa [#allocation4], 0  ;;  %s344_s0 = inlined_call_operand.hbm [shape: f32[16,32], index: 0, kind: input, shape index: {}]   ;;  %s345_s1 = inlined_call_operand.hbm [shape: f32[32,96], index: 1, kind: input, shape index: {}]   ;;  %s346_s2 = inlined_call_operand.hbm [shape: f32[16,96], index: 2, kind: output, shape index: {}]  }
   0x1   :  { %8 = vsyncpa [#allocation7], 0 }
   0x2   :  { %9 = vsyncpa [#allocation5], 0  ;;  %s272_s9 = smov [#allocation3]   ;;  %s200_s13 = scalar_lea.hbm %s344_s0, 256 }
   0x3   :  { %s15_s10 = sshll.u32 %s272_s9, 4  ;;  %p201_p0 = scmp.ne.s32.totalorder %s344_s0, %s200_s13  ;;  %s16_s10 = int_to_ptr.vmem [resolvable:$true] %s15_s10 }
   0x4   :  { %p204_p1 = scmp.lt.u32.totalorder %s200_s13, %s344_s0 }
   0x6   :  { %p206_p2 = pnand %p204_p1, %p201_p0 }
   0x8   :  { %209 = shalt.err (!%p206_p2)
}
   0x9   :  { %s210_s18 = scalar_lea.vmem %s16_s10, 256  ;;  %p215_p4 = scmp.lt.s32.totalorder %s16_s10, %s16_s10 }
   0xa   :  { %p211_p3 = scmp.ne.s32.totalorder %s16_s10, %s210_s18  ;;  %p216_p5 = scmp.lt.s32.totalorder %s210_s18, %s210_s18 }
   0xc   :  { %p217_p6 = por %p216_p5, %p215_p4 }
   0xe   :  { %p218_p7 = pnand %p217_p6, %p211_p3 }
  0x10   :  { %221 = shalt.err (!%p218_p7)
}
  0x11   :  { %s273_s19 = smov 128   ;;  %s274_s20 = smov 8  }
  0x12   :  { %21 = dma.hbm_to_vmem [thread:$0]  %s344_s0, 256, %s16_s10, [#allocation4], %s273_s19, %s273_s19, %s274_s20  }
  0x13   :  { %s275_s23 = smov [#allocation6]   ;;  %s222_s27 = scalar_lea.hbm %s345_s1, 512 }
  0x14   :  { %s27_s24 = sshll.u32 %s275_s23, 4  ;;  %p223_p8 = scmp.ne.s32.totalorder %s345_s1, %s222_s27  ;;  %s28_s24 = int_to_ptr.vmem [resolvable:$true] %s27_s24 }
  0x15   :  { %p226_p9 = scmp.lt.u32.totalorder %s222_s27, %s345_s1 }
  0x17   :  { %p228_p10 = pnand %p226_p9, %p223_p8 }
  0x19   :  { %231 = shalt.err (!%p228_p10)
}
  0x1a   :  { %s232_s4 = scalar_lea.vmem %s28_s24, 512  ;;  %p237_p12 = scmp.lt.s32.totalorder %s28_s24, %s28_s24 }
  0x1b   :  { %p233_p11 = scmp.ne.s32.totalorder %s28_s24, %s232_s4  ;;  %p238_p13 = scmp.lt.s32.totalorder %s232_s4, %s232_s4 }
  0x1d   :  { %p239_p0 = por %p238_p13, %p237_p12 }
  0x1f   :  { %p240_p1 = pnand %p239_p0, %p233_p11 }
  0x21   :  { %243 = shalt.err (!%p240_p1)
}
  0x22   :  { %33 = dma.hbm_to_vmem [thread:$0]  %s345_s1, 512, %s28_s24, [#allocation7], %s273_s19, %s273_s19, %s274_s20  }
  0x23   :  { %266 = dma.done.wait [#allocation4], 256  }
  0x24   :  { %267 = vsyncadd [#allocation4], 4294967040 }
  0x25   :  { %268 = dma.done.wait [#allocation7], 512  }
  0x26   :  { %269 = vsyncadd [#allocation7], 4294966784  ;;  %vm44_vm0 = vcmask 785408   ;;  %v276_v0 = vmov 0.0   ;;  %vm55_vm1 = vcmask 261120   ;;  %v51_v1 = vld [vmem:[#allocation6] sm:$0xff] }
  0x27   :  { %46 = vst.msk [vmem:[#allocation2 + $0x8] sm:$0xff] %vm44_vm0, %v276_v0  ;;  %45 = vst.msk [vmem:[#allocation2] sm:$0xff] %vm44_vm0, %v276_v0  ;;  %v52_v2 = vld [vmem:[#allocation6 + $0x8] sm:$0xff]  ;;  %v53_v3 = vld [vmem:[#allocation6 + $0x10] sm:$0xff]  ;;  %s277_s1 = smov [#allocation8]  }
  0x28   :  { %v186_v4 = vpack.c.bf16 %v52_v2, %v51_v1  ;;  %v54_v5 = vld [vmem:[#allocation6 + $0x18] sm:$0xff]  ;;  %v49_v6 = vld [vmem:[#allocation3] sm:$0xff]  ;;  %s154_s6 = sshll.u32 %s277_s1, 4  ;;  %s155_s6 = int_to_ptr.vmem [resolvable:$true] %s154_s6 }
  0x29   :  { %v190_v7 = vpack.c.bf16 %v54_v5, %v53_v3  ;;  %183 = vmatprep.mubr.msk.f32.mxu0 %vm55_vm1, %v49_v6  ;;  %v50_v8 = vld [vmem:[#allocation3 + $0x8] sm:$0xff]  ;;  %s244_s7 = scalar_lea.vmem %s155_s6, 256  ;;  %p249_p3 = scmp.lt.s32.totalorder %s155_s6, %s155_s6 }
  0x2a   :  { %187 = vmatprep.subr.bf16.mxu0 %v186_v4  ;;  %p245_p2 = scmp.ne.s32.totalorder %s155_s6, %s244_s7  ;;  %p250_p4 = scmp.lt.s32.totalorder %s244_s7, %s244_s7 }
  0x2b   :  { %189 = vmatpush3.bf16.msra.mxu0 %v186_v4 }
  0x2c   :  { %191 = vmatprep.subr.bf16.mxu0 %v190_v7  ;;  %p251_p5 = por %p250_p4, %p249_p3 }
  0x2e   :  { %v48_v9 = vld [vmem:[#allocation2 + $0x8] sm:$0xff]  ;;  %v47_v10 = vld [vmem:[#allocation2] sm:$0xff]  ;;  %p252_p6 = pnand %p251_p5, %p245_p2 }
  0x2f   :  { %193 = vmatpush3.bf16.msra.mxu0 %v190_v7 }
  0x32   :  { %184 = vmatmul.mubr.msk.f32.vlgmr.msra.gmra.mrb[0].mxu0 %vm55_vm1, %v50_v8 }
 0x105   :  { %v185_v11 = vpop.f32.mrb[0].mxu0 }
 0x106   :  { %v138_v12 = vadd.f32 %v185_v11, %v48_v9  ;;  %v128_v13 = vpop.f32.mrb[1].mxu0 }
 0x107   :  { %v137_v14 = vadd.f32 %v128_v13, %v47_v10 }
 0x108   :  { %141 = vst.msk [vmem:[#allocation2 + $0x8] sm:$0xff] %vm44_vm0, %v138_v12 }
 0x109   :  { %140 = vst.msk [vmem:[#allocation2] sm:$0xff] %vm44_vm0, %v137_v14 }
 0x10f   :  { %v146_v15 = vld [vmem:[#allocation2 + $0x8] sm:$0xff] }
 0x110   :  { %v145_v16 = vld [vmem:[#allocation2] sm:$0xff]  ;;  %148 = vst.msk [vmem:[#allocation8 + $0x8] sm:$0xff] %vm44_vm0, %v146_v15 }
 0x111   :  { %147 = vst.msk [vmem:[#allocation8] sm:$0xff] %vm44_vm0, %v145_v16 }
 0x112   :  { %255 = shalt.err (!%p252_p6)
}
 0x113   :  { %s256_s10 = scalar_lea.hbm %s346_s2, 256 }
 0x114   :  { %p257_p7 = scmp.ne.s32.totalorder %s346_s2, %s256_s10  ;;  %p260_p8 = scmp.lt.u32.totalorder %s256_s10, %s346_s2 }
 0x116   :  { %p262_p9 = pnand %p260_p8, %p257_p7 }
 0x118   :  { %265 = shalt.err (!%p262_p9)
}
 0x119   :  { %160 = dma.vmem_to_hbm [thread:$0]  %s155_s6, 256, %s346_s2, [#allocation5], %s273_s19, %s273_s19, %s274_s20  }
 0x11a   :  { %270 = dma.done.wait [#allocation5], 256  }
 0x11b   :  { %271 = vsyncadd [#allocation5], 4294967040 }
 0x11c   :  { %164 = vsyncpa [#allocation4], 1 }
 0x11d   :  { %165 = vsyncpa [#allocation7], 1 }
 0x11e   :  { %166 = vsyncpa [#allocation5], 1 }

</bundles_post_ra>
